<compile_context>
chip_gen: v7x
topology: tpu7x:2x2x1
jax: 0.10.0
libtpu: 0.0.40
codegen_flags: <defaults>
</compile_context>

<pallas_src>
import math

import jax
import jax.numpy as jnp
from jax.experimental import pallas as pl
from jax.experimental.pallas import tpu as pltpu


def _round_up(x, m):
    return ((x + m - 1) // m) * m


def _n_to_one_kernel(x1_ref, x2_ref, w1_ref, w2_ref, o_ref):
    """out[co] = sum_ci w1[co,ci]*x1[ci] + w2[co,ci]*x2[ci]  (dense slabs).

    x1_ref, x2_ref: (C_in, TILE_R, LANE) f32 in VMEM (dense spatial slabs).
    w1_ref, w2_ref: (C_out, C_in) f32 in SMEM (scalar reads).
    o_ref:          (C_out, TILE_R, LANE) f32 in VMEM.
    """
    c_out, c_in = w1_ref.shape
    for co in range(c_out):
        # Read per-channel (TILE_R, LANE) slabs directly from the refs inside
        # the loop: keeps live ranges narrow (no spill traffic).
        acc = w1_ref[co, 0] * x1_ref[0] + w2_ref[co, 0] * x2_ref[0]
        for ci in range(1, c_in):
            acc = acc + w1_ref[co, ci] * x1_ref[ci] + w2_ref[co, ci] * x2_ref[ci]
        o_ref[co] = acc.astype(o_ref.dtype)


def n_to_one_forward(x1_nchw, x2_nchw, w1, w2, *, lane=512, tile_r=512):
    """Equivalent of: conv1(x1) + conv2(x2), both 1x1 convs (3->3, no bias).

    x1_nchw, x2_nchw: (N, C_in, H, W) float32
    w1, w2:           (C_out, C_in, 1, 1) float32  (PyTorch Conv2d weight shape)
    returns:          (N, C_out, H, W) float32
    """
    N, C_in, H, W = x1_nchw.shape
    C_out = w1.shape[0]
    HW = H * W

    # Lane width: multiple of 128; shrink for small images so padding stays tiny.
    lane = min(lane, _round_up(HW, 128))
    HWp = _round_up(HW, lane)

    # Free reshape NCHW -> (N, C, HW); pad the spatial tail with zeros if needed
    # (pad region is computed but sliced away afterwards).
    x1_r = x1_nchw.reshape(N, C_in, HW)
    x2_r = x2_nchw.reshape(N, C_in, HW)
    if HWp != HW:
        pad = ((0, 0), (0, 0), (0, HWp - HW))
        x1_r = jnp.pad(x1_r, pad)
        x2_r = jnp.pad(x2_r, pad)

    R = HWp // lane
    x1_r = x1_r.reshape(N, C_in, R, lane)
    x2_r = x2_r.reshape(N, C_in, R, lane)

    w1_2d = w1[:, :, 0, 0]   # (C_out, C_in)
    w2_2d = w2[:, :, 0, 0]

    # Row tile: multiple of 8 (sublanes), or the full R for small images.
    if R <= tile_r:
        tr = R
    else:
        tr = max(8, (tile_r // 8) * 8)
    grid = (N, pl.cdiv(R, tr))

    out = pl.pallas_call(
        _n_to_one_kernel,
        out_shape=jax.ShapeDtypeStruct((N, C_out, R, lane), x1_nchw.dtype),
        grid_spec=pltpu.PrefetchScalarGridSpec(
            num_scalar_prefetch=0,
            grid=grid,
            in_specs=[
                # (None, ...) squeezes the batch dim; kernel sees (C_in, tr, lane).
                pl.BlockSpec((None, C_in, tr, lane), lambda n, t: (n, 0, t, 0)),
                pl.BlockSpec((None, C_in, tr, lane), lambda n, t: (n, 0, t, 0)),
                # Tiny 3x3 weights: whole array in SMEM, scalar reads.
                pl.BlockSpec(memory_space=pltpu.MemorySpace.SMEM),
                pl.BlockSpec(memory_space=pltpu.MemorySpace.SMEM),
            ],
            out_specs=pl.BlockSpec((None, C_out, tr, lane),
                                   lambda n, t: (n, 0, t, 0)),
        ),
        compiler_params=pltpu.CompilerParams(
            dimension_semantics=("parallel", "parallel"),
            # ~18 MiB actually used (3 arrays x 2 buffers x ~3 MiB); 48 MiB cap
            # gives headroom while staying inside v7x's 64 MiB per-TC VMEM.
            vmem_limit_bytes=48 * 1024 * 1024,
        ),
    )(x1_r, x2_r, w1_2d, w2_2d)

    # Drop spatial padding, back to NCHW (free reshapes).
    out = out.reshape(N, C_out, HWp)[:, :, :HW]
    return out.reshape(N, C_out, H, W)


if __name__ == "__main__":
    key = jax.random.PRNGKey(0)
    k1, k2, k3, k4 = jax.random.split(key, 4)

    # Shapes consistent with the module: Conv2d(3, 3, 1, 1, bias=False).
    N, C, H, W = 2, 3, 16, 16
    x1 = jax.random.normal(k1, (N, C, H, W), dtype=jnp.float32)
    x2 = jax.random.normal(k2, (N, C, H, W), dtype=jnp.float32)

    # Deterministic parameter init (kaiming-uniform-ish scale for a 1x1 conv).
    fan_in = C * 1 * 1
    bound = 1.0 / math.sqrt(fan_in)
    w1 = jax.random.uniform(k3, (C, C, 1, 1), jnp.float32, -bound, bound)
    w2 = jax.random.uniform(k4, (C, C, 1, 1), jnp.float32, -bound, bound)

    out = n_to_one_forward(x1, x2, w1, w2)
    jax.block_until_ready(out)

    # Pure-JAX reference (1x1 conv == einsum over channels).
    ref = (jnp.einsum("nchw,oc->nohw", x1, w1[:, :, 0, 0])
           + jnp.einsum("nchw,oc->nohw", x2, w2[:, :, 0, 0]))
    assert out.shape == (N, C, H, W)
    assert jnp.allclose(out, ref, atol=1e-5, rtol=1e-5)

    print("KERNEL_OK")
</pallas_src>

<mosaic_0001>
module attributes {stable_mosaic.version = 11 : i64} {
  func.func @_n_to_one_kernel(%arg0: i32, %arg1: i32, %arg2: memref<1x3x1x256xf32, #tpu.memory_space<vmem>>, %arg3: memref<1x3x1x256xf32, #tpu.memory_space<vmem>>, %arg4: memref<3x3xf32, #tpu.memory_space<smem>>, %arg5: memref<3x3xf32, #tpu.memory_space<smem>>, %arg6: memref<1x3x1x256xf32, #tpu.memory_space<vmem>>) attributes {dimension_semantics = [#tpu.dimension_semantics<parallel>, #tpu.dimension_semantics<parallel>], iteration_bounds = array<i64: 2, 1>, scalar_prefetch = 0 : i64, scratch_operands = 0 : i64, tpu.core_type = #tpu.core_type<tc>, window_params = [{transform_indices = @transform_0, window_bounds = array<i64: 1, 3, 1, 256>}, {transform_indices = @transform_1, window_bounds = array<i64: 1, 3, 1, 256>}, {transform_indices = @transform_2, window_bounds = array<i64: 3, 3>}, {transform_indices = @transform_3, window_bounds = array<i64: 3, 3>}, {transform_indices = @transform_4, window_bounds = array<i64: 1, 3, 1, 256>}]} {
    %c0 = arith.constant 0 : index
    %c0_0 = arith.constant 0 : index
    %0 = memref.load %arg4[%c0, %c0_0] : memref<3x3xf32, #tpu.memory_space<smem>>
    %c0_1 = arith.constant 0 : index
    %c0_2 = arith.constant 0 : index
    %c0_3 = arith.constant 0 : index
    %c0_4 = arith.constant 0 : index
    %1 = vector.load %arg2[%c0_1, %c0_2, %c0_3, %c0_4] : memref<1x3x1x256xf32, #tpu.memory_space<vmem>>, vector<1x1x1x256xf32>
    %2 = vector.shape_cast %1 : vector<1x1x1x256xf32> to vector<1x256xf32>
    %3 = vector.broadcast %0 : f32 to vector<1x256xf32>
    %4 = arith.mulf %3, %2 : vector<1x256xf32>
    %c0_5 = arith.constant 0 : index
    %c0_6 = arith.constant 0 : index
    %5 = memref.load %arg5[%c0_5, %c0_6] : memref<3x3xf32, #tpu.memory_space<smem>>
    %c0_7 = arith.constant 0 : index
    %c0_8 = arith.constant 0 : index
    %c0_9 = arith.constant 0 : index
    %c0_10 = arith.constant 0 : index
    %6 = vector.load %arg3[%c0_7, %c0_8, %c0_9, %c0_10] : memref<1x3x1x256xf32, #tpu.memory_space<vmem>>, vector<1x1x1x256xf32>
    %7 = vector.shape_cast %6 : vector<1x1x1x256xf32> to vector<1x256xf32>
    %8 = vector.broadcast %5 : f32 to vector<1x256xf32>
    %9 = arith.mulf %8, %7 : vector<1x256xf32>
    %10 = arith.addf %4, %9 : vector<1x256xf32>
    %c0_11 = arith.constant 0 : index
    %c1 = arith.constant 1 : index
    %11 = memref.load %arg4[%c0_11, %c1] : memref<3x3xf32, #tpu.memory_space<smem>>
    %c0_12 = arith.constant 0 : index
    %c1_13 = arith.constant 1 : index
    %c0_14 = arith.constant 0 : index
    %c0_15 = arith.constant 0 : index
    %12 = vector.load %arg2[%c0_12, %c1_13, %c0_14, %c0_15] : memref<1x3x1x256xf32, #tpu.memory_space<vmem>>, vector<1x1x1x256xf32>
    %13 = vector.shape_cast %12 : vector<1x1x1x256xf32> to vector<1x256xf32>
    %14 = vector.broadcast %11 : f32 to vector<1x256xf32>
    %15 = arith.mulf %14, %13 : vector<1x256xf32>
    %16 = arith.addf %10, %15 : vector<1x256xf32>
    %c0_16 = arith.constant 0 : index
    %c1_17 = arith.constant 1 : index
    %17 = memref.load %arg5[%c0_16, %c1_17] : memref<3x3xf32, #tpu.memory_space<smem>>
    %c0_18 = arith.constant 0 : index
    %c1_19 = arith.constant 1 : index
    %c0_20 = arith.constant 0 : index
    %c0_21 = arith.constant 0 : index
    %18 = vector.load %arg3[%c0_18, %c1_19, %c0_20, %c0_21] : memref<1x3x1x256xf32, #tpu.memory_space<vmem>>, vector<1x1x1x256xf32>
    %19 = vector.shape_cast %18 : vector<1x1x1x256xf32> to vector<1x256xf32>
    %20 = vector.broadcast %17 : f32 to vector<1x256xf32>
    %21 = arith.mulf %20, %19 : vector<1x256xf32>
    %22 = arith.addf %16, %21 : vector<1x256xf32>
    %c0_22 = arith.constant 0 : index
    %c2 = arith.constant 2 : index
    %23 = memref.load %arg4[%c0_22, %c2] : memref<3x3xf32, #tpu.memory_space<smem>>
    %c0_23 = arith.constant 0 : index
    %c2_24 = arith.constant 2 : index
    %c0_25 = arith.constant 0 : index
    %c0_26 = arith.constant 0 : index
    %24 = vector.load %arg2[%c0_23, %c2_24, %c0_25, %c0_26] : memref<1x3x1x256xf32, #tpu.memory_space<vmem>>, vector<1x1x1x256xf32>
    %25 = vector.shape_cast %24 : vector<1x1x1x256xf32> to vector<1x256xf32>
    %26 = vector.broadcast %23 : f32 to vector<1x256xf32>
    %27 = arith.mulf %26, %25 : vector<1x256xf32>
    %28 = arith.addf %22, %27 : vector<1x256xf32>
    %c0_27 = arith.constant 0 : index
    %c2_28 = arith.constant 2 : index
    %29 = memref.load %arg5[%c0_27, %c2_28] : memref<3x3xf32, #tpu.memory_space<smem>>
    %c0_29 = arith.constant 0 : index
    %c2_30 = arith.constant 2 : index
    %c0_31 = arith.constant 0 : index
    %c0_32 = arith.constant 0 : index
    %30 = vector.load %arg3[%c0_29, %c2_30, %c0_31, %c0_32] : memref<1x3x1x256xf32, #tpu.memory_space<vmem>>, vector<1x1x1x256xf32>
    %31 = vector.shape_cast %30 : vector<1x1x1x256xf32> to vector<1x256xf32>
    %32 = vector.broadcast %29 : f32 to vector<1x256xf32>
    %33 = arith.mulf %32, %31 : vector<1x256xf32>
    %34 = arith.addf %28, %33 : vector<1x256xf32>
    %c0_33 = arith.constant 0 : index
    %c0_34 = arith.constant 0 : index
    %c0_35 = arith.constant 0 : index
    %c0_36 = arith.constant 0 : index
    %35 = vector.load %arg6[%c0_33, %c0_34, %c0_35, %c0_36] : memref<1x3x1x256xf32, #tpu.memory_space<vmem>>, vector<1x1x1x256xf32>
    %36 = vector.shape_cast %35 : vector<1x1x1x256xf32> to vector<1x256xf32>
    %37 = vector.shape_cast %34 : vector<1x256xf32> to vector<1x1x1x256xf32>
    tpu.vector_store %arg6[%c0_33, %c0_34, %c0_35, %c0_36], %37 {strides = array<i32>} : memref<1x3x1x256xf32, #tpu.memory_space<vmem>>, vector<1x1x1x256xf32>,
    %c1_37 = arith.constant 1 : index
    %c0_38 = arith.constant 0 : index
    %38 = memref.load %arg4[%c1_37, %c0_38] : memref<3x3xf32, #tpu.memory_space<smem>>
    %c0_39 = arith.constant 0 : index
    %c0_40 = arith.constant 0 : index
    %c0_41 = arith.constant 0 : index
    %c0_42 = arith.constant 0 : index
    %39 = vector.load %arg2[%c0_39, %c0_40, %c0_41, %c0_42] : memref<1x3x1x256xf32, #tpu.memory_space<vmem>>, vector<1x1x1x256xf32>
    %40 = vector.shape_cast %39 : vector<1x1x1x256xf32> to vector<1x256xf32>
    %41 = vector.broadcast %38 : f32 to vector<1x256xf32>
    %42 = arith.mulf %41, %40 : vector<1x256xf32>
    %c1_43 = arith.constant 1 : index
    %c0_44 = arith.constant 0 : index
    %43 = memref.load %arg5[%c1_43, %c0_44] : memref<3x3xf32, #tpu.memory_space<smem>>
    %c0_45 = arith.constant 0 : index
    %c0_46 = arith.constant 0 : index
    %c0_47 = arith.constant 0 : index
    %c0_48 = arith.constant 0 : index
    %44 = vector.load %arg3[%c0_45, %c0_46, %c0_47, %c0_48] : memref<1x3x1x256xf32, #tpu.memory_space<vmem>>, vector<1x1x1x256xf32>
    %45 = vector.shape_cast %44 : vector<1x1x1x256xf32> to vector<1x256xf32>
    %46 = vector.broadcast %43 : f32 to vector<1x256xf32>
    %47 = arith.mulf %46, %45 : vector<1x256xf32>
    %48 = arith.addf %42, %47 : vector<1x256xf32>
    %c1_49 = arith.constant 1 : index
    %c1_50 = arith.constant 1 : index
    %49 = memref.load %arg4[%c1_49, %c1_50] : memref<3x3xf32, #tpu.memory_space<smem>>
    %c0_51 = arith.constant 0 : index
    %c1_52 = arith.constant 1 : index
    %c0_53 = arith.constant 0 : index
    %c0_54 = arith.constant 0 : index
    %50 = vector.load %arg2[%c0_51, %c1_52, %c0_53, %c0_54] : memref<1x3x1x256xf32, #tpu.memory_space<vmem>>, vector<1x1x1x256xf32>
    %51 = vector.shape_cast %50 : vector<1x1x1x256xf32> to vector<1x256xf32>
    %52 = vector.broadcast %49 : f32 to vector<1x256xf32>
    %53 = arith.mulf %52, %51 : vector<1x256xf32>
    %54 = arith.addf %48, %53 : vector<1x256xf32>
    %c1_55 = arith.constant 1 : index
    %c1_56 = arith.constant 1 : index
    %55 = memref.load %arg5[%c1_55, %c1_56] : memref<3x3xf32, #tpu.memory_space<smem>>
    %c0_57 = arith.constant 0 : index
    %c1_58 = arith.constant 1 : index
    %c0_59 = arith.constant 0 : index
    %c0_60 = arith.constant 0 : index
    %56 = vector.load %arg3[%c0_57, %c1_58, %c0_59, %c0_60] : memref<1x3x1x256xf32, #tpu.memory_space<vmem>>, vector<1x1x1x256xf32>
    %57 = vector.shape_cast %56 : vector<1x1x1x256xf32> to vector<1x256xf32>
    %58 = vector.broadcast %55 : f32 to vector<1x256xf32>
    %59 = arith.mulf %58, %57 : vector<1x256xf32>
    %60 = arith.addf %54, %59 : vector<1x256xf32>
    %c1_61 = arith.constant 1 : index
    %c2_62 = arith.constant 2 : index
    %61 = memref.load %arg4[%c1_61, %c2_62] : memref<3x3xf32, #tpu.memory_space<smem>>
    %c0_63 = arith.constant 0 : index
    %c2_64 = arith.constant 2 : index
    %c0_65 = arith.constant 0 : index
    %c0_66 = arith.constant 0 : index
    %62 = vector.load %arg2[%c0_63, %c2_64, %c0_65, %c0_66] : memref<1x3x1x256xf32, #tpu.memory_space<vmem>>, vector<1x1x1x256xf32>
    %63 = vector.shape_cast %62 : vector<1x1x1x256xf32> to vector<1x256xf32>
    %64 = vector.broadcast %61 : f32 to vector<1x256xf32>
    %65 = arith.mulf %64, %63 : vector<1x256xf32>
    %66 = arith.addf %60, %65 : vector<1x256xf32>
    %c1_67 = arith.constant 1 : index
    %c2_68 = arith.constant 2 : index
    %67 = memref.load %arg5[%c1_67, %c2_68] : memref<3x3xf32, #tpu.memory_space<smem>>
    %c0_69 = arith.constant 0 : index
    %c2_70 = arith.constant 2 : index
    %c0_71 = arith.constant 0 : index
    %c0_72 = arith.constant 0 : index
    %68 = vector.load %arg3[%c0_69, %c2_70, %c0_71, %c0_72] : memref<1x3x1x256xf32, #tpu.memory_space<vmem>>, vector<1x1x1x256xf32>
    %69 = vector.shape_cast %68 : vector<1x1x1x256xf32> to vector<1x256xf32>
    %70 = vector.broadcast %67 : f32 to vector<1x256xf32>
    %71 = arith.mulf %70, %69 : vector<1x256xf32>
    %72 = arith.addf %66, %71 : vector<1x256xf32>
    %c0_73 = arith.constant 0 : index
    %c1_74 = arith.constant 1 : index
    %c0_75 = arith.constant 0 : index
    %c0_76 = arith.constant 0 : index
    %73 = vector.load %arg6[%c0_73, %c1_74, %c0_75, %c0_76] : memref<1x3x1x256xf32, #tpu.memory_space<vmem>>, vector<1x1x1x256xf32>
    %74 = vector.shape_cast %73 : vector<1x1x1x256xf32> to vector<1x256xf32>
    %75 = vector.shape_cast %72 : vector<1x256xf32> to vector<1x1x1x256xf32>
    tpu.vector_store %arg6[%c0_73, %c1_74, %c0_75, %c0_76], %75 {strides = array<i32>} : memref<1x3x1x256xf32, #tpu.memory_space<vmem>>, vector<1x1x1x256xf32>,
    %c2_77 = arith.constant 2 : index
    %c0_78 = arith.constant 0 : index
    %76 = memref.load %arg4[%c2_77, %c0_78] : memref<3x3xf32, #tpu.memory_space<smem>>
    %c0_79 = arith.constant 0 : index
    %c0_80 = arith.constant 0 : index
    %c0_81 = arith.constant 0 : index
    %c0_82 = arith.constant 0 : index
    %77 = vector.load %arg2[%c0_79, %c0_80, %c0_81, %c0_82] : memref<1x3x1x256xf32, #tpu.memory_space<vmem>>, vector<1x1x1x256xf32>
    %78 = vector.shape_cast %77 : vector<1x1x1x256xf32> to vector<1x256xf32>
    %79 = vector.broadcast %76 : f32 to vector<1x256xf32>
    %80 = arith.mulf %79, %78 : vector<1x256xf32>
    %c2_83 = arith.constant 2 : index
    %c0_84 = arith.constant 0 : index
    %81 = memref.load %arg5[%c2_83, %c0_84] : memref<3x3xf32, #tpu.memory_space<smem>>
    %c0_85 = arith.constant 0 : index
    %c0_86 = arith.constant 0 : index
    %c0_87 = arith.constant 0 : index
    %c0_88 = arith.constant 0 : index
    %82 = vector.load %arg3[%c0_85, %c0_86, %c0_87, %c0_88] : memref<1x3x1x256xf32, #tpu.memory_space<vmem>>, vector<1x1x1x256xf32>
    %83 = vector.shape_cast %82 : vector<1x1x1x256xf32> to vector<1x256xf32>
    %84 = vector.broadcast %81 : f32 to vector<1x256xf32>
    %85 = arith.mulf %84, %83 : vector<1x256xf32>
    %86 = arith.addf %80, %85 : vector<1x256xf32>
    %c2_89 = arith.constant 2 : index
    %c1_90 = arith.constant 1 : index
    %87 = memref.load %arg4[%c2_89, %c1_90] : memref<3x3xf32, #tpu.memory_space<smem>>
    %c0_91 = arith.constant 0 : index
    %c1_92 = arith.constant 1 : index
    %c0_93 = arith.constant 0 : index
    %c0_94 = arith.constant 0 : index
    %88 = vector.load %arg2[%c0_91, %c1_92, %c0_93, %c0_94] : memref<1x3x1x256xf32, #tpu.memory_space<vmem>>, vector<1x1x1x256xf32>
    %89 = vector.shape_cast %88 : vector<1x1x1x256xf32> to vector<1x256xf32>
    %90 = vector.broadcast %87 : f32 to vector<1x256xf32>
    %91 = arith.mulf %90, %89 : vector<1x256xf32>
    %92 = arith.addf %86, %91 : vector<1x256xf32>
    %c2_95 = arith.constant 2 : index
    %c1_96 = arith.constant 1 : index
    %93 = memref.load %arg5[%c2_95, %c1_96] : memref<3x3xf32, #tpu.memory_space<smem>>
    %c0_97 = arith.constant 0 : index
    %c1_98 = arith.constant 1 : index
    %c0_99 = arith.constant 0 : index
    %c0_100 = arith.constant 0 : index
    %94 = vector.load %arg3[%c0_97, %c1_98, %c0_99, %c0_100] : memref<1x3x1x256xf32, #tpu.memory_space<vmem>>, vector<1x1x1x256xf32>
    %95 = vector.shape_cast %94 : vector<1x1x1x256xf32> to vector<1x256xf32>
    %96 = vector.broadcast %93 : f32 to vector<1x256xf32>
    %97 = arith.mulf %96, %95 : vector<1x256xf32>
    %98 = arith.addf %92, %97 : vector<1x256xf32>
    %c2_101 = arith.constant 2 : index
    %c2_102 = arith.constant 2 : index
    %99 = memref.load %arg4[%c2_101, %c2_102] : memref<3x3xf32, #tpu.memory_space<smem>>
    %c0_103 = arith.constant 0 : index
    %c2_104 = arith.constant 2 : index
    %c0_105 = arith.constant 0 : index
    %c0_106 = arith.constant 0 : index
    %100 = vector.load %arg2[%c0_103, %c2_104, %c0_105, %c0_106] : memref<1x3x1x256xf32, #tpu.memory_space<vmem>>, vector<1x1x1x256xf32>
    %101 = vector.shape_cast %100 : vector<1x1x1x256xf32> to vector<1x256xf32>
    %102 = vector.broadcast %99 : f32 to vector<1x256xf32>
    %103 = arith.mulf %102, %101 : vector<1x256xf32>
    %104 = arith.addf %98, %103 : vector<1x256xf32>
    %c2_107 = arith.constant 2 : index
    %c2_108 = arith.constant 2 : index
    %105 = memref.load %arg5[%c2_107, %c2_108] : memref<3x3xf32, #tpu.memory_space<smem>>
    %c0_109 = arith.constant 0 : index
    %c2_110 = arith.constant 2 : index
    %c0_111 = arith.constant 0 : index
    %c0_112 = arith.constant 0 : index
    %106 = vector.load %arg3[%c0_109, %c2_110, %c0_111, %c0_112] : memref<1x3x1x256xf32, #tpu.memory_space<vmem>>, vector<1x1x1x256xf32>
    %107 = vector.shape_cast %106 : vector<1x1x1x256xf32> to vector<1x256xf32>
    %108 = vector.broadcast %105 : f32 to vector<1x256xf32>
    %109 = arith.mulf %108, %107 : vector<1x256xf32>
    %110 = arith.addf %104, %109 : vector<1x256xf32>
    %c0_113 = arith.constant 0 : index
    %c2_114 = arith.constant 2 : index
    %c0_115 = arith.constant 0 : index
    %c0_116 = arith.constant 0 : index
    %111 = vector.load %arg6[%c0_113, %c2_114, %c0_115, %c0_116] : memref<1x3x1x256xf32, #tpu.memory_space<vmem>>, vector<1x1x1x256xf32>
    %112 = vector.shape_cast %111 : vector<1x1x1x256xf32> to vector<1x256xf32>
    %113 = vector.shape_cast %110 : vector<1x256xf32> to vector<1x1x1x256xf32>
    tpu.vector_store %arg6[%c0_113, %c2_114, %c0_115, %c0_116], %113 {strides = array<i32>} : memref<1x3x1x256xf32, #tpu.memory_space<vmem>>, vector<1x1x1x256xf32>,
    return
  }
  func.func @transform_0(%arg0: i32, %arg1: i32) -> (i32, i32, i32, i32) {
    %c0_i32 = arith.constant 0 : i32
    %c0_i32_0 = arith.constant 0 : i32
    %c0_i32_1 = arith.constant 0 : i32
    return %arg0, %c0_i32, %arg1, %c0_i32_0 : i32, i32, i32, i32
  }
  func.func @transform_1(%arg0: i32, %arg1: i32) -> (i32, i32, i32, i32) {
    %c0_i32 = arith.constant 0 : i32
    %c0_i32_0 = arith.constant 0 : i32
    %c0_i32_1 = arith.constant 0 : i32
    return %arg0, %c0_i32, %arg1, %c0_i32_0 : i32, i32, i32, i32
  }
  func.func @transform_2(%arg0: i32, %arg1: i32) -> (i32, i32) {
    %c0_i32 = arith.constant 0 : i32
    %c0_i32_0 = arith.constant 0 : i32
    %c0_i32_1 = arith.constant 0 : i32
    return %c0_i32, %c0_i32_0 : i32, i32
  }
  func.func @transform_3(%arg0: i32, %arg1: i32) -> (i32, i32) {
    %c0_i32 = arith.constant 0 : i32
    %c0_i32_0 = arith.constant 0 : i32
    %c0_i32_1 = arith.constant 0 : i32
    return %c0_i32, %c0_i32_0 : i32, i32
  }
  func.func @transform_4(%arg0: i32, %arg1: i32) -> (i32, i32, i32, i32) {
    %c0_i32 = arith.constant 0 : i32
    %c0_i32_0 = arith.constant 0 : i32
    %c0_i32_1 = arith.constant 0 : i32
    return %arg0, %c0_i32, %arg1, %c0_i32_0 : i32, i32, i32, i32
  }
}

</mosaic_0001>

<bundles_post_ra>
// kernel: tpu_custom_call.1
= control target key start
LH: loop header
LB: loop body
LE: loop exit
PB: predicated region body
PF: predicated region fallthrough
CT: control target
= control target key end

     0   :  { %s1267_s0 = inlined_call_operand.hbm [shape: f32[2,3,1,256], index: 0, kind: input, shape index: {}]   ;;  %s1268_s1 = inlined_call_operand.hbm [shape: f32[2,3,1,256], index: 1, kind: input, shape index: {}]   ;;  %s1269_s2 = inlined_call_operand.vmem [shape: f32[3,3], index: 2, kind: input, shape index: {}]   ;;  %s1270_s3 = inlined_call_operand.vmem [shape: f32[3,3], index: 3, kind: input, shape index: {}]   ;;  %s1271_s4 = inlined_call_operand.hbm [shape: f32[2,3,1,256], index: 4, kind: output, shape index: {}]  }
   0x1   :  { %1279 = sst [smem:[#allocation17_spill]] %s1267_s0 }
   0x2   :  { %1280 = sst [smem:[#allocation18_spill]] %s1269_s2 }
   0x3   :  { %1281 = sst [smem:[#allocation19_spill]] %s1270_s3 }
   0x4   :  { %9 = vsyncpa [#allocation3], 0 }
   0x5   :  { %11 = vsyncpa [#allocation3 + $0x1], 0 }
   0x6   :  { %12 = vsyncpa [#allocation7], 0 }
   0x7   :  { %14 = vsyncpa [#allocation7 + $0x1], 0 }
   0x8   :  { %15 = vsyncpa [#allocation5], 0 }
   0x9   :  { %16 = vsyncpa [#allocation10], 0 }
   0xa   :  { %17 = vsyncpa [#allocation4], 0 }
   0xb   :  { %19 = vsyncpa [#allocation4 + $0x1], 0  ;;  %s918_s15 = smov 0   ;;  %s920_s16 = smov 0  }
   0xc   :  { %s922_s17 = smov 0   ;;  %s924_s18 = smov 0  }
   0xd   :  { %s926_s19 = smov 0   ;;  %s928_s20 = smov 0  }
   0xe LB: > { %s556_s21 = sadd.s32 4294967295, %s882_s20   ;;  %s557_s22 = sadd.s32 4294967294, %s882_s20   ;;  %s882_s20 = sphi %s928_s20, %s25_s20   ;;  %s878_s19 = sphi %s926_s19, %s1307_s19   ;;  %s874_s18 = sphi %s924_s18, %s1306_s18   ;;  %s870_s17 = sphi %s922_s17, %s1305_s17   ;;  %s866_s16 = sphi %s920_s16, %s1304_s16   ;;  %s862_s15 = sphi %s918_s15, %s1303_s15  }
   0xf   : > { %s46_s23 = sadd.s32 1, %s870_s17  ;;  %p53_p0 = scmp.ne.s32.totalorder %s870_s17, %s866_s16 }
  0x10   : > { %p54_p1 = scmp.eq.s32.totalorder %s882_s20, 0  ;;  %p59_p2 = scmp.ne.s32.totalorder %s866_s16, %s862_s15 }
  0x11   : > { %p956_p3 = scmp.eq.s32.totalorder %s556_s21, 0  ;;  %p155_p4 = scmp.eq.s32.totalorder %s556_s21, 1 }
  0x12   : > { %p960_p5 = por %p54_p1, %p53_p0  ;;  %p161_p6 = scmp.eq.s32.totalorder %s557_s22, 1 }
  0x13   : > { %s1282_s24 = scalar_select %p956_p3, 1, 0 }
  0x14   : > { %p966_p7 = por %p956_p3, %p59_p2  ;;  %p970_p8 = por %p155_p4, %p53_p0 }
  0x15   : > { %p974_p9 = por %p161_p6, %p59_p2  ;;  %p558_p10 = scmp.ge.s32.totalorder %s882_s20, 1 }
  0x16   : > { %s1284_s26 = scalar_select %p966_p7, 1, 0 }
  0x17   : > { %s1285_s27 = scalar_select %p970_p8, 1, 0 }
  0x18   : > { %s1286_s28 = scalar_select %p974_p9, 1, 0 }
  0x19   : > { %p168_p11 = scmp.lt.s32.totalorder %s882_s20, 3  ;;  %s1287_s2 = sld [smem:[#allocation18_spill]] }
  0x1a   : > { %p640_p0 = scmp.lt.s32.totalorder %s882_s20, 2  ;;  %s1289_s3 = sld [smem:[#allocation19_spill]] }
  0x1b   : > { %p983_p12 = pnand %p558_p10, %p168_p11 }
  0x1c   : > { %p996_p2 = pnand %p640_p0, %p960_p5 }
  0x1d   : > { %s1288_s6 = scalar_select %p983_p12, 1, 0 }
  0x1e   : > { %p620_p1 = pneg %p983_p12 }
  0x1f   : > { %s181_s5 = sshll.u32 %s1287_s2, 4  ;;  %s182_s5 = int_to_ptr.vmem [resolvable:$true] %s181_s5 }
  0x20   : > { %s192_s9 = sshll.u32 %s1289_s3, 4  ;;  %p1002_p4 = pnand %p620_p1, %p956_p3  ;;  %s193_s9 = int_to_ptr.vmem [resolvable:$true] %s192_s9 }
  0x21   : > { %s1290_s10 = scalar_select %p996_p2, 1, 0 }
  0x22   : > { %s698_s12 = scalar_lea.vmem %s182_s5, 64  ;;  %p700_p10 = pneg %p1002_p4 }
  0x23   : > { %p699_p6 = scmp.ne.s32.totalorder %s182_s5, %s698_s12  ;;  %p706_p9 = scmp.lt.s32.totalorder %s182_s5, %s182_s5 }
  0x24   : > { %p707_p8 = scmp.lt.s32.totalorder %s698_s12, %s698_s12 }
  0x25   : > { %p701_p11 = pnand %p700_p10, %p699_p6 }
  0x26   : > { %p708_p7 = por %p707_p8, %p706_p9 }
  0x27   : > { %p702_p13 = pneg %p701_p11 }
  0x29   : > { %p709_p5 = pnand %p708_p7, %p702_p13 }
  0x2b   : > { %712 = shalt.err (!%p709_p5)
}
  0x2c   : > { %s884_s13 = smov [#allocation8]   ;;  %s713_s14 = scalar_lea.vmem %s193_s9, 64 }
  0x2d   : > { %623 = dma.vmem_to_smem (!%p1002_p4), %s182_s5, 64, %s884_s13, [#allocation5]  }
  0x2e   : > { %p714_p0 = scmp.ne.s32.totalorder %s193_s9, %s713_s14  ;;  %p721_p12 = scmp.lt.s32.totalorder %s193_s9, %s193_s9 }
  0x2f   : > { %p722_p2 = scmp.lt.s32.totalorder %s713_s14, %s713_s14 }
  0x30   : > { %p716_p1 = pnand %p714_p0, %p700_p10 }
  0x31   : > { %p723_p6 = por %p722_p2, %p721_p12 }
  0x32   : > { %p717_p3 = pneg %p716_p1 }
  0x34   : > { %p724_p11 = pnand %p723_p6, %p717_p3 }
  0x36   : > { %727 = shalt.err (!%p724_p11)
}
  0x37   : > { %s885_s21 = smov [#allocation9]   ;;  %s37_s22 = sadd.s32 1, %s878_s19 }
  0x38   : > { %626 = dma.vmem_to_smem (!%p1002_p4), %s193_s9, 64, %s885_s21, [#allocation10]  }
  0x39   : > { %s1014_s25 = sand.u32 1, %s870_s17   ;;  %p39_p3 = scmp.ge.s32.totalorder %s37_s22, 2 }
  0x3a   : > { %s1278_s29 = smul.u32 6, %s1014_s25  ;;  %s1292_s0 = sld [smem:[#allocation17_spill]] }
  0x3b   : > { %s1309_s22 = smov (%p39_p3, %s37_s22), 0  ;;  %s601_s30 = smul.u32 96, %s878_s19 }
  0x3c   : > { %s41_s5 = ssub.s32 %s878_s19, %s1309_s22  ;;  %s207_s7 = scalar_lea.vmem [#allocation2], %s1278_s29 }
  0x3d   : > { %s216_s8 = sshll.u32 %s207_s7, 4  ;;  %p44_p7 = scmp.eq.s32.totalorder %s41_s5, 0  ;;  %s1031_s8 = int_to_ptr.vmem [resolvable:$true] %s216_s8 }
  0x3e   : > { %s204_s14 = scalar_lea.sflag [#allocation3], %s1014_s25  ;;  %p1293_p9 = scmp.ne.s32.totalorder %s1290_s10, 0 }
  0x3f   : > { %s1036_s13 = scalar_select %p44_p7, %s870_s17, %s46_s23  }
  0x40   : > { %s1029_s12 = scalar_lea.hbm %s1292_s0, %s601_s30  ;;  %p730_p12 = pneg %p1293_p9 }
  0x41   : > { %s728_s21 = scalar_lea.hbm %s1029_s12, 96  ;;  %s733_s9 = scalar_lea.hbm %s1292_s0, 192 }
  0x42   : > { %p729_p8 = scmp.ne.s32.totalorder %s1029_s12, %s728_s21  ;;  %p734_p4 = scmp.lt.u32.totalorder %s1029_s12, %s1292_s0 }
  0x43   : > { %p735_p10 = scmp.lt.u32.totalorder %s733_s9, %s728_s21  ;;  %p737_p0 = scmp.lt.u32.totalorder %s728_s21, %s1029_s12 }
  0x44   : > { %p731_p13 = pnand %p730_p12, %p729_p8 }
  0x45   : > { %p736_p5 = por %p735_p10, %p734_p4 }
  0x46   : > { %p732_p2 = pneg %p731_p13 }
  0x47   : > { %p738_p1 = por %p737_p0, %p736_p5 }
  0x49   : > { %p739_p6 = pnand %p738_p1, %p732_p2 }
  0x4b   : > { %742 = shalt.err (!%p739_p6)
}
  0x4c   : > { %s743_s23 = scalar_lea.vmem %s1031_s8, 96  ;;  %s886_s5 = smov [#allocation2]  }
  0x4d   : > { %p744_p11 = scmp.ne.s32.totalorder %s1031_s8, %s743_s23  ;;  %s748_s7 = sshll.u32 %s886_s5, 4  ;;  %s749_s7 = int_to_ptr.vmem [resolvable:$false] %s748_s7 }
  0x4e   : > { %s750_s29 = scalar_lea.vmem %s749_s7, 192  ;;  %p751_p8 = scmp.lt.s32.totalorder %s1031_s8, %s749_s7 }
  0x4f   : > { %p746_p3 = pnand %p744_p11, %p730_p12  ;;  %p752_p13 = scmp.lt.s32.totalorder %s750_s29, %s743_s23 }
  0x51   : > { %p747_p7 = pneg %p746_p3  ;;  %p753_p4 = por %p752_p13, %p751_p8 }
  0x53   : > { %p754_p10 = pnand %p753_p4, %p747_p7 }
  0x55   : > { %757 = shalt.err (!%p754_p10)
}
  0x56   : > { %s887_s21 = smov 32   ;;  %s888_s9 = smov 2  }
  0x57   : > { %630 = dma.hbm_to_vmem [thread:$0]  (!%p1293_p9), %s1029_s12, 96, %s1031_s8, %s204_s14, %s887_s21, %s887_s21, %s888_s9  }
  0x58   : > { %s1074_s5 = scalar_lea.hbm %s1268_s1, %s601_s30  ;;  %s1294_s7 = smul.u32 6, %s1014_s25 }
  0x59   : > { %s227_s2 = scalar_lea.sflag [#allocation7], %s1014_s25  ;;  %s758_s3 = scalar_lea.hbm %s1074_s5, 96 }
  0x5a   : > { %s230_s29 = scalar_lea.vmem [#allocation6], %s1294_s7  ;;  %p759_p2 = scmp.ne.s32.totalorder %s1074_s5, %s758_s3 }
  0x5b   : > { %s239_s0 = sshll.u32 %s230_s29, 4  ;;  %s763_s30 = scalar_lea.hbm %s1268_s1, 192  ;;  %s1078_s0 = int_to_ptr.vmem [resolvable:$true] %s239_s0 }
  0x5c   : > { %p761_p5 = pnand %p759_p2, %p730_p12  ;;  %p764_p1 = scmp.lt.u32.totalorder %s1074_s5, %s1268_s1 }
  0x5d   : > { %p765_p6 = scmp.lt.u32.totalorder %s763_s30, %s758_s3  ;;  %p767_p3 = scmp.lt.u32.totalorder %s758_s3, %s1074_s5 }
  0x5e   : > { %p762_p0 = pneg %p761_p5 }
  0x5f   : > { %p766_p11 = por %p765_p6, %p764_p1 }
  0x61   : > { %p768_p7 = por %p767_p3, %p766_p11 }
  0x63   : > { %p769_p8 = pnand %p768_p7, %p762_p0 }
  0x65   : > { %772 = shalt.err (!%p769_p8)
}
  0x66   : > { %s773_s23 = scalar_lea.vmem %s1078_s0, 96  ;;  %s889_s7 = smov [#allocation6]  }
  0x67   : > { %p774_p13 = scmp.ne.s32.totalorder %s1078_s0, %s773_s23  ;;  %s778_s29 = sshll.u32 %s889_s7, 4  ;;  %s779_s29 = int_to_ptr.vmem [resolvable:$false] %s778_s29 }
  0x68   : > { %s780_s8 = scalar_lea.vmem %s779_s29, 192  ;;  %p781_p2 = scmp.lt.s32.totalorder %s1078_s0, %s779_s29 }
  0x69   : > { %p776_p4 = pnand %p774_p13, %p730_p12  ;;  %p782_p5 = scmp.lt.s32.totalorder %s780_s8, %s773_s23 }
  0x6b   : > { %p777_p10 = pneg %p776_p4  ;;  %p783_p1 = por %p782_p5, %p781_p2 }
  0x6d   : > { %p784_p6 = pnand %p783_p1, %p777_p10 }
  0x6f   : > { %787 = shalt.err (!%p784_p6)
}
  0x70   : > { %633 = dma.hbm_to_vmem [thread:$0]  (!%p1293_p9), %s1074_s5, 96, %s1078_s0, %s227_s2, %s887_s21, %s887_s21, %s888_s9  }
  0x71   : > { %p1295_p12 = scmp.ne.s32.totalorder %s1288_s6, 0 }
  0x72   : > { %s1112_s3 = sand.u32 (!%p1295_p12), 1, %s866_s16   ;;  %p1296_p0 = scmp.ne.s32.totalorder (!%p1295_p12), %s1284_s26, 0 }
  0x73   : > { %251 = sbr.rel (%p1295_p12) target bundleno = 173 (0xad), region = 36  ;;  %s254_s10 = scalar_lea.sflag (!%p1295_p12), [#allocation3], %s1112_s3 }
  0x74   : > { %s1115_s12 = smul.u32 (!%p1295_p12), 6, %s1112_s3 }
  0x76   : > { %s1119_s30 = scalar_lea.vmem (!%p1295_p12), [#allocation2], %s1115_s12 }
  0x7a   : > { %841 = dma.done.wait (%p1296_p0), %s254_s10, 96  }
  0x7b   : > { %843 = vsyncadd (%p1296_p0), %s254_s10, 4294967200  ;;  %s263_s0 = scalar_lea.sflag [#allocation7], %s1112_s3  ;;  %s1127_s2 = scalar_lea.vmem [#allocation6], %s1115_s12 }
  0x7c   : > { %845 = dma.done.wait (%p1296_p0), %s263_s0, 96  }
  0x7d   : > { %847 = vsyncadd (%p1296_p0), %s263_s0, 4294967200  ;;  %p1297_p9 = scmp.ne.s32.totalorder %s1282_s24, 0 }
  0x7f   : > { %849 = dma.done.wait (%p1297_p9), [#allocation5], 64  }
  0x80   : > { %851 = vsyncadd (%p1297_p9), [#allocation5], 4294967232 }
  0x81   : > { %853 = dma.done.wait (%p1297_p9), [#allocation10], 64  }
  0x82   : > { %855 = vsyncadd (%p1297_p9), [#allocation10], 4294967232 }
  0x83   : > { %279 = sfence }
  0x84   : > { %s305_s6 = sld [smem:[#allocation8]]  ;;  %s567_s26 = sld [smem:[#allocation8 + $0x1]]  ;;  %v306_v0 = vld [vmem:[%s1119_s30] sm:$0x3]  ;;  %v310_v1 = vld [vmem:[%s1127_s2] sm:$0x3]  ;;  %v338_v22 = vlaneseq }
  0x85   : > { %s309_s25 = sld [smem:[#allocation9]]  ;;  %s569_s21 = sld [smem:[#allocation9 + $0x1]]  ;;  %v568_v2 = vld [vmem:[%s1119_s30 + $0x2] sm:$0x3]  ;;  %v570_v7 = vld [vmem:[%s1127_s2 + $0x2] sm:$0x3] }
  0x86   : > { %s1141_s9 = sld [smem:[#allocation8 + $0x2]]  ;;  %s1146_s14 = sld [smem:[#allocation8 + $0x80]]  ;;  %v572_v8 = vld [vmem:[%s1119_s30 + $0x4] sm:$0x3]  ;;  %v344_v12 = vld [vmem:[%s1119_s30] sm:$0x3] }
  0x87   : > { %s1143_s5 = sld [smem:[#allocation9 + $0x2]]  ;;  %s1150_s24 = sld [smem:[#allocation9 + $0x80]]  ;;  %v574_v14 = vld [vmem:[%s1127_s2 + $0x4] sm:$0x3]  ;;  %v348_v15 = vld [vmem:[%s1127_s2] sm:$0x3] }
  0x88   : > { %s1152_s11 = sld [smem:[#allocation8 + $0x81]]  ;;  %s1158_s7 = sld [smem:[#allocation8 + $0x82]]  ;;  %v578_v20 = vld [vmem:[%s1119_s30 + $0x2] sm:$0x3]  ;;  %v580_v25 = vld [vmem:[%s1127_s2 + $0x2] sm:$0x3] }
  0x89   : > { %s1154_s23 = sld [smem:[#allocation9 + $0x81]]  ;;  %s1161_s29 = sld [smem:[#allocation9 + $0x82]]  ;;  %v582_v30 = vld [vmem:[%s1119_s30 + $0x4] sm:$0x3]  ;;  %v375_v34 = vld [vmem:[%s1119_s30] sm:$0x3] }
  0x8a   : > { %v307_v3 = vstv %s305_s6  ;;  %v317_v6 = vstv %s567_s26  ;;  %s1163_s8 = sld [smem:[#allocation8 + $0x100]]  ;;  %s1173_s0 = sld [smem:[#allocation8 + $0x101]]  ;;  %v379_v35 = vld [vmem:[%s1127_s2] sm:$0x3]  ;;  %v584_v39 = vld [vmem:[%s1127_s2 + $0x4] sm:$0x3] }
  0x8b   : > { %v308_v4 = vmul.f32 %v307_v3, %v306_v0  ;;  %v311_v5 = vstv %s309_s25  ;;  %v318_v10 = vmul.f32 %v568_v2, %v317_v6  ;;  %v323_v11 = vstv %s569_s21  ;;  %s1168_s10 = sld [smem:[#allocation9 + $0x100]]  ;;  %s1175_s6 = sld [smem:[#allocation9 + $0x101]]  ;;  %v589_v45 = vld [vmem:[%s1119_s30 + $0x2] sm:$0x3]  ;;  %v591_v50 = vld [vmem:[%s1127_s2 + $0x2] sm:$0x3] }
  0x8c   : > { %v312_v9 = vmul.f32 %v311_v5, %v310_v1  ;;  %v329_v13 = vstv %s1141_s9  ;;  %v324_v17 = vmul.f32 %v570_v7, %v323_v11  ;;  %v345_v19 = vstv %s1146_s14  ;;  %s1179_s25 = sld [smem:[#allocation8 + $0x102]]  ;;  %v593_v54 = vld [vmem:[%s1119_s30 + $0x4] sm:$0x3]  ;;  %v595_v61 = vld [vmem:[%s1127_s2 + $0x4] sm:$0x3]  ;;  %s304_s21 = scalar_lea.vmem [#allocation11], %s1115_s12 }
  0x8d   : > { %v335_v18 = vstv %s1143_s5  ;;  %v330_v21 = vmul.f32 %v572_v8, %v329_v13  ;;  %v346_v23 = vmul.f32 %v345_v19, %v344_v12  ;;  %v349_v24 = vstv %s1150_s24  ;;  %s1184_s26 = sld [smem:[#allocation9 + $0x102]]  ;;  %s421_s9 = sshll.u32 %s304_s21, 4  ;;  %s1209_s9 = int_to_ptr.vmem [resolvable:$true] %s421_s9 }
  0x8e   : > { %v313_v16 = vadd.f32 %v312_v9, %v308_v4  ;;  %v350_v27 = vmul.f32 %v349_v24, %v348_v15  ;;  %v354_v28 = vstv %s1152_s11  ;;  %v336_v31 = vmul.f32 %v574_v14, %v335_v18  ;;  %s605_s30 = smul.u32 96, %s874_s18  ;;  %s406_s14 = scalar_lea.sflag [#allocation4], %s1112_s3 }
  0x8f   : > { %v359_v29 = vstv %s1154_s23  ;;  %v355_v32 = vmul.f32 %v578_v20, %v354_v28  ;;  %v364_v33 = vstv %s1158_s7  ;;  %v369_v40 = vstv %s1161_s29  ;;  %s788_s18 = scalar_lea.vmem %s1209_s9, 96  ;;  %p1300_p3 = scmp.ne.s32.totalorder %s1285_s27, 0 }
  0x90   : > { %v319_v26 = vadd.f32 %v318_v10, %v313_v16  ;;  %v351_v37 = vadd.f32 %v350_v27, %v346_v23  ;;  %v360_v38 = vmul.f32 %v580_v25, %v359_v29  ;;  %vm1191_vm0 = vcmp.lt.s32.totalorder %v338_v22, 256  ;;  %s1216_s5 = scalar_lea.hbm %s1271_s4, %s605_s30  ;;  %p789_p11 = scmp.ne.s32.totalorder %s1209_s9, %s788_s18 }
  0x91   : > { %v365_v42 = vmul.f32 %v582_v30, %v364_v33  ;;  %v376_v43 = vstv %s1163_s8  ;;  %v380_v44 = vstv %s1168_s10  ;;  %v370_v51 = vmul.f32 %v584_v39, %v369_v40  ;;  %s890_s24 = smov [#allocation11]  }
  0x92   : > { %v325_v36 = vadd.f32 %v324_v17, %v319_v26  ;;  %v356_v47 = vadd.f32 %v355_v32, %v351_v37  ;;  %v377_v48 = vmul.f32 %v376_v43, %v375_v34  ;;  %v381_v49 = vmul.f32 %v380_v44, %v379_v35  ;;  %p790_p7 = pnand %p789_p11, %p1300_p3  ;;  %s792_s11 = sshll.u32 %s890_s24, 4  ;;  %s793_s11 = int_to_ptr.vmem [resolvable:$false] %s792_s11 }
  0x93   : > { %v385_v52 = vstv %s1173_s0  ;;  %v390_v53 = vstv %s1175_s6  ;;  %v395_v55 = vstv %s1179_s25  ;;  %v400_v62 = vstv %s1184_s26  ;;  %s794_s23 = scalar_lea.vmem %s793_s11, 192  ;;  %p795_p13 = scmp.lt.s32.totalorder %s1209_s9, %s793_s11 }
  0x94   : > { %v331_v46 = vadd.f32 %v330_v21, %v325_v36  ;;  %v361_v57 = vadd.f32 %v360_v38, %v356_v47  ;;  %v382_v58 = vadd.f32 %v381_v49, %v377_v48  ;;  %v386_v59 = vmul.f32 %v589_v45, %v385_v52  ;;  %p791_p8 = pneg %p790_p7  ;;  %p796_p4 = scmp.lt.s32.totalorder %s794_s23, %s788_s18 }
  0x95   : > { %v391_v60 = vmul.f32 %v591_v50, %v390_v53  ;;  %v396_v1 = vmul.f32 %v593_v54, %v395_v55  ;;  %v401_v4 = vmul.f32 %v595_v61, %v400_v62 }
  0x96   : > { %v337_v56 = vadd.f32 %v336_v31, %v331_v46  ;;  %v366_v63 = vadd.f32 %v365_v42, %v361_v57  ;;  %v387_v0 = vadd.f32 %v386_v59, %v382_v58  ;;  %p797_p10 = por %p796_p4, %p795_p13 }
  0x98   : > { %342 = vst.msk [vmem:[%s304_s21] sm:$0x3] %vm1191_vm0, %v337_v56  ;;  %v371_v2 = vadd.f32 %v370_v51, %v366_v63  ;;  %v392_v3 = vadd.f32 %v391_v60, %v387_v0  ;;  %p798_p2 = pnand %p797_p10, %p791_p8 }
  0x9a   : > { %585 = vst.msk [vmem:[%s304_s21 + $0x2] sm:$0x3] %vm1191_vm0, %v371_v2  ;;  %v397_v5 = vadd.f32 %v396_v1, %v392_v3 }
  0x9c   : > { %v402_v6 = vadd.f32 %v401_v4, %v397_v5 }
  0x9e   : > { %596 = vst.msk [vmem:[%s304_s21 + $0x4] sm:$0x3] %vm1191_vm0, %v402_v6 }
  0x9f   : > { %801 = shalt.err (!%p798_p2)
}
  0xa0   : > { %s802_s7 = scalar_lea.hbm %s1216_s5, 96  ;;  %s806_s10 = scalar_lea.hbm %s1271_s4, 192 }
  0xa1   : > { %p803_p5 = scmp.ne.s32.totalorder %s1216_s5, %s802_s7  ;;  %p807_p12 = scmp.lt.u32.totalorder %s1216_s5, %s1271_s4 }
  0xa2   : > { %p808_p0 = scmp.lt.u32.totalorder %s806_s10, %s802_s7  ;;  %p810_p11 = scmp.lt.u32.totalorder %s802_s7, %s1216_s5 }
  0xa3   : > { %p804_p1 = pnand %p803_p5, %p1300_p3 }
  0xa4   : > { %p809_p9 = por %p808_p0, %p807_p12 }
  0xa5   : > { %p805_p6 = pneg %p804_p1 }
  0xa6   : > { %p811_p7 = por %p810_p11, %p809_p9 }
  0xa8   : > { %p812_p8 = pnand %p811_p7, %p805_p6 }
  0xaa   : > { %815 = shalt.err (!%p812_p8)
}
  0xab   : > { %s891_s25 = smov 32   ;;  %s892_s26 = smov 2  }
  0xac   : > { %618 = dma.vmem_to_hbm [thread:$0]  (%p1300_p3), %s1209_s9, 96, %s1216_s5, %s406_s14, %s891_s25, %s891_s25, %s892_s26  }
  0xad PF: > { %s436_s21 = sand.u32 1, %s862_s15   ;;  %p1301_p13 = scmp.ne.s32.totalorder %s1286_s28, 0 }
  0xae   : > { %p1302_p4 = scmp.ge.s32.totalorder %s882_s20, 2  ;;  %s437_s30 = scalar_lea.sflag [#allocation4], %s436_s21 }
  0xb0   : > { %p635_p10 = pnand %p1302_p4, %p1301_p13 }
  0xb2   : > { %857 = dma.done.wait (!%p635_p10), %s437_s30, 96  }
  0xb3   : > { %859 = vsyncadd (!%p635_p10), %s437_s30, 4294967200  ;;  %s25_s20 = sadd.s32 1, %s882_s20   ;;  %s1303_s15 = smov %s866_s16 }
  0xb4   : > { %p22_p2 = scmp.ge.s32.totalorder %s25_s20, 4   ;;  %s1304_s16 = smov %s870_s17 }
  0xb5   : > { %s1305_s17 = smov %s1036_s13  ;;  %s1306_s18 = smov %s878_s19 }
  0xb6   : > { %s1307_s19 = smov %s1309_s22  ;;  %24 = sbr.rel (!%p22_p2) target bundleno = 14 (0xe), region = 109 }
  0xbd   :  { %442 = vsyncpa [#allocation3], 1 }
  0xbe   :  { %444 = vsyncpa [#allocation3 + $0x1], 1 }
  0xbf   :  { %445 = vsyncpa [#allocation7], 1 }
  0xc0   :  { %447 = vsyncpa [#allocation7 + $0x1], 1 }
  0xc1   :  { %448 = vsyncpa [#allocation4], 1 }
  0xc2   :  { %450 = vsyncpa [#allocation4 + $0x1], 1 }
  0xc3   :  { %451 = vsyncpa [#allocation5], 1 }
  0xc4   :  { %453 = vsyncpa [#allocation5 + $0x1], 1 }
  0xc5   :  { %454 = vsyncpa [#allocation10], 1 }

</bundles_post_ra>
